<compile_context>
chip_gen: v7x
topology: tpu7x:2x2x1
jax: 0.10.0
libtpu: 0.0.40
codegen_flags: <defaults>
</compile_context>

<pallas_src>
import functools

import jax
import jax.numpy as jnp
import numpy as np
from jax.experimental import pallas as pl
from jax.experimental.pallas import tpu as pltpu


# -----------------------------------------------------------------------------
# Pallas kernel: fused transposed 4-gate GEMM + ConvLSTM elementwise update
# -----------------------------------------------------------------------------
def _convlstm_gates_kernel(patch_ref, w_ref, c_ref, ch_ref, cc_ref):
    # patch_ref: (Dp, tm)     bf16  im2col columns [x taps | h taps | ones row]
    # w_ref:     (4*hidp, Dp) bf16  gate order [i | f | c | o], bias folded in
    # c_ref:     (hidp, tm)   f32   previous cell state (transposed layout)
    # ch_ref:    (hidp, tm)   f32   new hidden state
    # cc_ref:    (hidp, tm)   f32   new cell state
    hid = c_ref.shape[0]

    # bf16 x bf16 -> f32 accumulation on the MXU.
    pre = jnp.dot(w_ref[...], patch_ref[...],
                  preferred_element_type=jnp.float32)        # (4*hidp, tm) f32

    # Gate slices along the sublane axis (hidp is a multiple of 8 -> cheap).
    gi = pre[0 * hid:1 * hid, :]
    gf = pre[1 * hid:2 * hid, :]
    gc = pre[2 * hid:3 * hid, :]
    go = pre[3 * hid:4 * hid, :]

    ci = jax.nn.sigmoid(gi)
    cf = jax.nn.sigmoid(gf)
    cc = cf * c_ref[...] + ci * jnp.tanh(gc)
    co = jax.nn.sigmoid(go)

    cc_ref[...] = cc.astype(cc_ref.dtype)
    ch_ref[...] = (co * jnp.tanh(cc)).astype(ch_ref.dtype)


# -----------------------------------------------------------------------------
# Glue: circular im2col (transposed layout) + weight packing (plain JAX)
# -----------------------------------------------------------------------------
def _round_up(v, m):
    return ((v + m - 1) // m) * m


def _circular_taps_t(x_nchw, k, stride, pad):
    """Circular ('wrap') padded im2col, transposed: returns (k*k*C, N*Ho*Wo).

    Row order is (ky*k + kx)*C + c, matching `_w2mat`.
    """
    n, chan, hgt, wid = x_nchw.shape
    xp = jnp.pad(x_nchw, ((0, 0), (0, 0), (pad, pad), (pad, pad)), mode="wrap")
    ho = (hgt + 2 * pad - k) // stride + 1
    wo = (wid + 2 * pad - k) // stride + 1
    taps = []
    for ky in range(k):
        for kx in range(k):
            taps.append(
                xp[:, :,
                   ky:ky + (ho - 1) * stride + 1:stride,
                   kx:kx + (wo - 1) * stride + 1:stride])
    col = jnp.stack(taps, axis=0)                 # (k*k, N, C, Ho, Wo)
    col = jnp.transpose(col, (0, 2, 1, 3, 4))     # (k*k, C, N, Ho, Wo)
    return col.reshape(k * k * chan, n * ho * wo), ho, wo


def _w2mat(w_oihw):
    """(Cout, Cin, K, K) PyTorch conv weight -> (K*K*Cin, Cout) im2col matrix."""
    cout, cin, k, _ = w_oihw.shape
    return jnp.transpose(w_oihw, (2, 3, 1, 0)).reshape(k * k * cin, cout)


def _pick_row_tile(m, tm_max):
    """Largest lane tile <= tm_max (multiple of 128) giving >= 2 grid steps."""
    m128 = _round_up(m, 128)
    half = _round_up(max(m128 // 2, 128), 128)
    return max(128, min(tm_max, half, m128))


def convlstm_cell_forward(x, h, c, params, *, input_kernel_size, input_stride,
                          input_padding, tm=512):
    """ConvLSTMCell forward. x:(N,Cin,H,W), h,c:(N,Chid,Ho,Wo) NCHW float32.

    Returns (ch, cc) in NCHW, matching the PyTorch module semantics.
    `tm` is the max lane tile (flattened spatial positions per grid step).
    """
    n = x.shape[0]
    hid = c.shape[1]
    hid_p = _round_up(hid, 8)          # sublane-friendly hidden size

    # Circular im2col in transposed layout (channel-major rows, spatial lanes).
    xcol, ho, wo = _circular_taps_t(x, input_kernel_size, input_stride,
                                    input_padding)
    hcol, ho2, wo2 = _circular_taps_t(h, 3, 1, 1)
    assert (ho, wo) == (ho2, wo2) == tuple(h.shape[2:4]) == tuple(c.shape[2:4]), \
        "spatial mismatch between x-conv output and h/c"

    m = n * ho * wo
    ones_row = jnp.ones((1, m), jnp.float32)      # bias row (folded into GEMM)
    patches_t = jnp.concatenate([xcol, hcol, ones_row], axis=0)   # (D+1, M)
    d_aug = patches_t.shape[0]

    # Pack the 8 conv weights + biases into one (4*hid_p, Dp) transposed
    # operand; gate order [i | f | c | o] along the output (sublane) axis.
    # Each gate's output block is zero-padded from hid to hid_p rows so gate
    # slicing inside the kernel stays on 8-row sublane boundaries.
    w_cols, b_cols = [], []
    for g in ("i", "f", "c", "o"):
        wx = _w2mat(params["Wx" + g])
        wh = _w2mat(params["Wh" + g])
        col = jnp.concatenate([wx, wh], axis=0)                    # (D, hid)
        col = jnp.pad(col, ((0, 0), (0, hid_p - hid)))             # (D, hid_p)
        w_cols.append(col)
        b_cols.append(jnp.pad(params["bx" + g], (0, hid_p - hid)))
    w_big = jnp.concatenate(w_cols, axis=1)                        # (D, 4*hid_p)
    b_big = jnp.concatenate(b_cols).reshape(1, 4 * hid_p)          # (1, 4*hid_p)
    w_aug = jnp.concatenate([w_big, b_big], axis=0)                # (D+1, 4*hid_p)

    # Zero-pad the contraction dim (no effect on the result).
    d_pad = _round_up(d_aug, 128)
    patches_t = jnp.pad(patches_t, ((0, d_pad - d_aug), (0, 0)))
    w_aug = jnp.pad(w_aug, ((0, d_pad - d_aug), (0, 0)))

    # Lane tiling over M (>= 2 grid steps when possible for v7x's 2 TCs).
    tm_eff = _pick_row_tile(m, tm)
    m_pad = _round_up(m, tm_eff)

    c_t = jnp.transpose(c, (1, 0, 2, 3)).reshape(hid, m)           # (hid, M) f32
    c_t = jnp.pad(c_t, ((0, hid_p - hid), (0, m_pad - m)))
    if m_pad != m:
        patches_t = jnp.pad(patches_t, ((0, 0), (0, m_pad - m)))

    # bf16 GEMM operands; accumulation + gate math stay f32 in the kernel.
    patches_t = patches_t.astype(jnp.bfloat16)
    w_t = jnp.transpose(w_aug, (1, 0)).astype(jnp.bfloat16)        # (4*hid_p, Dp)

    out_shape = (jax.ShapeDtypeStruct((hid_p, m_pad), jnp.float32),
                 jax.ShapeDtypeStruct((hid_p, m_pad), jnp.float32))

    # Advisory cost hint for XLA's scheduler around the custom call.
    cost = pl.CostEstimate(
        flops=2 * (4 * hid_p) * d_pad * m_pad + 10 * hid_p * m_pad,
        transcendentals=5 * hid_p * m_pad,
        bytes_accessed=(patches_t.size * 2 + w_t.size * 2
                        + c_t.size * 4 + 2 * hid_p * m_pad * 4),
    )

    ch_t, cc_t = pl.pallas_call(
        _convlstm_gates_kernel,
        out_shape=out_shape,
        grid=(m_pad // tm_eff,),
        in_specs=[
            pl.BlockSpec((d_pad, tm_eff), lambda j: (0, j)),       # patch tile
            pl.BlockSpec((4 * hid_p, d_pad), lambda j: (0, 0)),    # resident W
            pl.BlockSpec((hid_p, tm_eff), lambda j: (0, j)),       # prev cell
        ],
        out_specs=(
            pl.BlockSpec((hid_p, tm_eff), lambda j: (0, j)),
            pl.BlockSpec((hid_p, tm_eff), lambda j: (0, j)),
        ),
        compiler_params=pltpu.CompilerParams(
            dimension_semantics=("parallel",),
            # Allow XLA to fuse the im2col / transpose / bf16-cast producers
            # into the kernel's input streams (avoids materializing the
            # (Dp, M) patch matrix and the transposed cell state in HBM).
            allow_input_fusion=[True, False, True],
        ),
        cost_estimate=cost,
    )(patches_t, w_t, c_t)

    ch = jnp.transpose(ch_t[:hid, :m].reshape(hid, n, ho, wo), (1, 0, 2, 3))
    cc = jnp.transpose(cc_t[:hid, :m].reshape(hid, n, ho, wo), (1, 0, 2, 3))
    return ch, cc


# -----------------------------------------------------------------------------
# Pure-JAX reference (lax conv with circular padding) for validation
# -----------------------------------------------------------------------------
def _ref_forward(x, h, c, params, input_kernel_size, input_stride,
                 input_padding):
    def conv(inp, w, b, stride, pad):
        xp = jnp.pad(inp, ((0, 0), (0, 0), (pad, pad), (pad, pad)), mode="wrap")
        out = jax.lax.conv_general_dilated(
            xp, w, (stride, stride), "VALID",
            dimension_numbers=("NCHW", "OIHW", "NCHW"))
        if b is not None:
            out = out + b[None, :, None, None]
        return out

    wxi = conv(x, params["Wxi"], params["bxi"], input_stride, input_padding)
    whi = conv(h, params["Whi"], None, 1, 1)
    wxf = conv(x, params["Wxf"], params["bxf"], input_stride, input_padding)
    whf = conv(h, params["Whf"], None, 1, 1)
    wxc = conv(x, params["Wxc"], params["bxc"], input_stride, input_padding)
    whc = conv(h, params["Whc"], None, 1, 1)
    wxo = conv(x, params["Wxo"], params["bxo"], input_stride, input_padding)
    who = conv(h, params["Who"], None, 1, 1)

    ci = jax.nn.sigmoid(wxi + whi)
    cf = jax.nn.sigmoid(wxf + whf)
    cc = cf * c + ci * jnp.tanh(wxc + whc)
    co = jax.nn.sigmoid(wxo + who)
    ch = co * jnp.tanh(cc)
    return ch, cc


# -----------------------------------------------------------------------------
# Deterministic parameter init (mirrors the module's __init__ shapes / biases)
# -----------------------------------------------------------------------------
def init_params(key, in_ch, hid_ch, in_k):
    keys = jax.random.split(key, 8)
    params = {}

    def uinit(k, shape, fan_in):
        bound = 1.0 / np.sqrt(fan_in)
        return jax.random.uniform(k, shape, jnp.float32, -bound, bound)

    names_x = ("Wxi", "Wxf", "Wxc", "Wxo")
    names_h = ("Whi", "Whf", "Whc", "Who")
    for i, nm in enumerate(names_x):
        params[nm] = uinit(keys[i], (hid_ch, in_ch, in_k, in_k),
                           in_ch * in_k * in_k)
    for i, nm in enumerate(names_h):
        params[nm] = uinit(keys[4 + i], (hid_ch, hid_ch, 3, 3), hid_ch * 9)

    # nn.init.zeros_ on Wxi/Wxf/Wxc bias, Wxo bias filled with 1.0
    params["bxi"] = jnp.zeros((hid_ch,), jnp.float32)
    params["bxf"] = jnp.zeros((hid_ch,), jnp.float32)
    params["bxc"] = jnp.zeros((hid_ch,), jnp.float32)
    params["bxo"] = jnp.ones((hid_ch,), jnp.float32)
    return params


if __name__ == "__main__":
    # Small shapes consistent with the module's forward:
    #   x: (N, Cin, H, W), h/c: (N, Chid, H, W) with same-spatial circular convs.
    N, CIN, HID, S = 2, 4, 32, 16
    IN_K, IN_STRIDE, IN_PAD = 3, 1, 1

    key = jax.random.PRNGKey(0)
    kx, kh, kc, kp = jax.random.split(key, 4)
    x = jax.random.normal(kx, (N, CIN, S, S), jnp.float32)
    h = jax.random.normal(kh, (N, HID, S, S), jnp.float32)
    c = jax.random.normal(kc, (N, HID, S, S), jnp.float32)
    params = init_params(kp, CIN, HID, IN_K)

    fwd = functools.partial(convlstm_cell_forward,
                            input_kernel_size=IN_K,
                            input_stride=IN_STRIDE,
                            input_padding=IN_PAD)
    ch, cc = jax.jit(fwd)(x, h, c, params)
    jax.block_until_ready((ch, cc))

    # bf16 GEMM operands -> loosened tolerance vs the f32 reference
    # (cell-state accumulation itself stays f32 inside the kernel).
    ch_ref, cc_ref = _ref_forward(x, h, c, params, IN_K, IN_STRIDE, IN_PAD)
    np.testing.assert_allclose(np.asarray(ch), np.asarray(ch_ref),
                               rtol=2e-2, atol=2e-2)
    np.testing.assert_allclose(np.asarray(cc), np.asarray(cc_ref),
                               rtol=2e-2, atol=2e-2)

    print("KERNEL_OK")
</pallas_src>

<mosaic_0001>
module attributes {stable_mosaic.version = 11 : i64} {
  func.func @_convlstm_gates_kernel(%arg0: i32, %arg1: memref<384x256xbf16, #tpu.memory_space<vmem>>, %arg2: memref<128x384xbf16, #tpu.memory_space<vmem>>, %arg3: memref<32x256xf32, #tpu.memory_space<vmem>>, %arg4: memref<32x256xf32, #tpu.memory_space<vmem>>, %arg5: memref<32x256xf32, #tpu.memory_space<vmem>>) attributes {dimension_semantics = [#tpu.dimension_semantics<parallel>], iteration_bounds = array<i64: 2>, scalar_prefetch = 0 : i64, scratch_operands = 0 : i64, tpu.core_type = #tpu.core_type<tc>, window_params = [{transform_indices = @transform_0, window_bounds = array<i64: 384, 256>}, {pipeline_mode = #tpu.pipeline_mode<synchronous>, transform_indices = @transform_1, window_bounds = array<i64: 128, 384>}, {transform_indices = @transform_2, window_bounds = array<i64: 32, 256>}, {transform_indices = @transform_3, window_bounds = array<i64: 32, 256>}, {transform_indices = @transform_4, window_bounds = array<i64: 32, 256>}]} {
    %c0 = arith.constant 0 : index
    %c0_0 = arith.constant 0 : index
    %0 = vector.load %arg2[%c0, %c0_0] : memref<128x384xbf16, #tpu.memory_space<vmem>>, vector<128x384xbf16>
    %c0_1 = arith.constant 0 : index
    %c0_2 = arith.constant 0 : index
    %1 = vector.load %arg1[%c0_1, %c0_2] : memref<384x256xbf16, #tpu.memory_space<vmem>>, vector<384x256xbf16>
    %cst = arith.constant dense<0.000000e+00> : vector<128x256xf32>
    %2 = tpu.matmul %0, %1, %cst {dimension_numbers = #tpu.dot_dimension_numbers<[1], [0], [0], [1], [0, 0, 1, 1], [], []>} : vector<128x384xbf16>, vector<384x256xbf16>, vector<128x256xf32> -> vector<128x256xf32>
    %3 = vector.extract_strided_slice %2 {offsets = [0, 0], sizes = [32, 256], strides = [1, 1]} : vector<128x256xf32> to vector<32x256xf32>
    %4 = vector.extract_strided_slice %2 {offsets = [32, 0], sizes = [32, 256], strides = [1, 1]} : vector<128x256xf32> to vector<32x256xf32>
    %5 = vector.extract_strided_slice %2 {offsets = [64, 0], sizes = [32, 256], strides = [1, 1]} : vector<128x256xf32> to vector<32x256xf32>
    %6 = vector.extract_strided_slice %2 {offsets = [96, 0], sizes = [32, 256], strides = [1, 1]} : vector<128x256xf32> to vector<32x256xf32>
    %7 = arith.negf %3 : vector<32x256xf32>
    %8 = math.exp %7 : vector<32x256xf32>
    %cst_3 = arith.constant 1.000000e+00 : f32
    %9 = vector.broadcast %cst_3 : f32 to vector<32x256xf32>
    %10 = arith.addf %9, %8 : vector<32x256xf32>
    %11 = arith.divf %9, %10 : vector<32x256xf32>
    %12 = arith.negf %4 : vector<32x256xf32>
    %13 = math.exp %12 : vector<32x256xf32>
    %cst_4 = arith.constant 1.000000e+00 : f32
    %14 = vector.broadcast %cst_4 : f32 to vector<32x256xf32>
    %15 = arith.addf %14, %13 : vector<32x256xf32>
    %16 = arith.divf %14, %15 : vector<32x256xf32>
    %c0_5 = arith.constant 0 : index
    %c0_6 = arith.constant 0 : index
    %17 = vector.load %arg3[%c0_5, %c0_6] : memref<32x256xf32, #tpu.memory_space<vmem>>, vector<32x256xf32>
    %18 = arith.mulf %16, %17 : vector<32x256xf32>
    %19 = math.tanh %5 : vector<32x256xf32>
    %20 = arith.mulf %11, %19 : vector<32x256xf32>
    %21 = arith.addf %18, %20 : vector<32x256xf32>
    %22 = arith.negf %6 : vector<32x256xf32>
    %23 = math.exp %22 : vector<32x256xf32>
    %cst_7 = arith.constant 1.000000e+00 : f32
    %24 = vector.broadcast %cst_7 : f32 to vector<32x256xf32>
    %25 = arith.addf %24, %23 : vector<32x256xf32>
    %26 = arith.divf %24, %25 : vector<32x256xf32>
    %c0_8 = arith.constant 0 : index
    %c0_9 = arith.constant 0 : index
    %27 = vector.load %arg5[%c0_8, %c0_9] : memref<32x256xf32, #tpu.memory_space<vmem>>, vector<32x256xf32>
    tpu.vector_store %arg5[%c0_8, %c0_9], %21 {strides = array<i32>} : memref<32x256xf32, #tpu.memory_space<vmem>>, vector<32x256xf32>,
    %28 = math.tanh %21 : vector<32x256xf32>
    %29 = arith.mulf %26, %28 : vector<32x256xf32>
    %c0_10 = arith.constant 0 : index
    %c0_11 = arith.constant 0 : index
    %30 = vector.load %arg4[%c0_10, %c0_11] : memref<32x256xf32, #tpu.memory_space<vmem>>, vector<32x256xf32>
    tpu.vector_store %arg4[%c0_10, %c0_11], %29 {strides = array<i32>} : memref<32x256xf32, #tpu.memory_space<vmem>>, vector<32x256xf32>,
    return
  }
  func.func @transform_0(%arg0: i32) -> (i32, i32) {
    %c0_i32 = arith.constant 0 : i32
    %c0_i32_0 = arith.constant 0 : i32
    return %c0_i32, %arg0 : i32, i32
  }
  func.func @transform_1(%arg0: i32) -> (i32, i32) {
    %c0_i32 = arith.constant 0 : i32
    %c0_i32_0 = arith.constant 0 : i32
    %c0_i32_1 = arith.constant 0 : i32
    return %c0_i32, %c0_i32_0 : i32, i32
  }
  func.func @transform_2(%arg0: i32) -> (i32, i32) {
    %c0_i32 = arith.constant 0 : i32
    %c0_i32_0 = arith.constant 0 : i32
    return %c0_i32, %arg0 : i32, i32
  }
  func.func @transform_3(%arg0: i32) -> (i32, i32) {
    %c0_i32 = arith.constant 0 : i32
    %c0_i32_0 = arith.constant 0 : i32
    return %c0_i32, %arg0 : i32, i32
  }
  func.func @transform_4(%arg0: i32) -> (i32, i32) {
    %c0_i32 = arith.constant 0 : i32
    %c0_i32_0 = arith.constant 0 : i32
    return %c0_i32, %arg0 : i32, i32
  }
}

</mosaic_0001>

<bundles_post_ra>
// kernel: convlstm_cell_forward.2
= control target key start
LH: loop header
LB: loop body
LE: loop exit
PB: predicated region body
PF: predicated region fallthrough
CT: control target
= control target key end

     0   :  { %s3755_s0 = inlined_call_operand.vmem [shape: bf16[128,384], index: 0, kind: input, shape index: {}]   ;;  %s3756_s1 = inlined_call_operand.vmem [shape: f32[32,512], index: 1, kind: input, shape index: {}]   ;;  %s3757_s2 = inlined_call_operand.vmem [shape: bf16[325,512], index: 2, kind: input, shape index: {}]   ;;  %s3758_s3 = inlined_call_operand.<no memory space> [shape: bf16[], index: 3, kind: input, shape index: {}]   ;;  %s3759_s4 = inlined_call_operand.vmem [shape: f32[32,512], index: 4, kind: output, shape index: {0}]   ;;  %s3760_s5 = inlined_call_operand.vmem [shape: f32[32,512], index: 5, kind: output, shape index: {1}]  }
   0x1   :  { %v11_v0 = vstv %s3758_s3 }
   0x2   :  { %v3423_v1 = vunpack.i.l.bf16 %v11_v0 }
   0x3   :  { %s3425_s20 = smov 0   ;;  %s3427_s21 = smov 0  }
   0x4   :  { %s3429_s22 = smov 0  }
   0x5 LB: > { %s3441_s3 = sadd.s32 4294967295, %s3386_s22   ;;  %s3444_s23 = sadd.s32 1, %s3386_s22   ;;  %s3386_s22 = sphi %s3429_s22, %s3764_s22   ;;  %s3382_s21 = sphi %s3427_s21, %s3763_s21   ;;  %s3378_s20 = sphi %s3425_s20, %s3762_s20  }
   0x6   : > { %s72_s24 = ssub.s32 %s3386_s22, %s3444_s23  ;;  %s75_s25 = sadd.s32 1, %s3382_s21 }
   0x7   : > { %p73_p0 = scmp.eq.s32.totalorder %s72_s24, 0  ;;  %p82_p1 = scmp.ne.s32.totalorder %s3382_s21, %s3378_s20 }
   0x8   : > { %p83_p2 = scmp.eq.s32.totalorder %s3386_s22, 0  ;;  %p112_p3 = scmp.eq.s32.totalorder %s3441_s3, 1 }
   0x9   : > { %s3454_s26 = scalar_select %p73_p0, %s3382_s21, %s75_s25  }
   0xa   : > { %p84_p4 = por %p83_p2, %p82_p1  ;;  %p3456_p5 = por %p112_p3, %p82_p1 }
   0xb   : > { %p2600_p6 = scmp.ge.s32.totalorder %s3386_s22, 2 }
   0xd   : > { %163 = sbr.rel (%p2600_p6) target bundleno = 28 (0x1c), region = 20 }
  0x14   : > { %175 = sbr.rel (!%p84_p4) target bundleno = 28 (0x1c), region = 28  ;;  %s177_s28 = sand.u32 (%p84_p4), 1, %s3382_s21  }
  0x15   : > { %s2795_s29 = sshll.u32 (%p84_p4), %s3386_s22, 4  ;;  %s2601_s30 = sshll.u32 (%p84_p4), %s177_s28, 6 }
  0x16   : > { %s182_s8 = scalar_lea.vmem (%p84_p4), %s3756_s1, %s2795_s29  ;;  %s179_s9 = scalar_lea.vmem (%p84_p4), [#allocation7], %s2601_s30 }
  0x17   : > { %v195_v2 = vld [vmem:[%s182_s8] sm:$0xff] (%p84_p4)  ;;  %v197_v3 = vld [vmem:[%s182_s8 + $0x8] sm:$0xff] (%p84_p4) }
  0x18   : > { %v199_v4 = vld [vmem:[%s182_s8 + $0x20] sm:$0xff] (%p84_p4)  ;;  %196 = vst [vmem:[%s179_s9] sm:$0xff] (%p84_p4), %v195_v2  ;;  %198 = vst [vmem:[%s179_s9 + $0x8] sm:$0xff] (%p84_p4), %v197_v3  ;;  %v201_v5 = vld [vmem:[%s182_s8 + $0x28] sm:$0xff] (%p84_p4) }
  0x19   : > { %200 = vst [vmem:[%s179_s9 + $0x10] sm:$0xff] (%p84_p4), %v199_v4  ;;  %v203_v6 = vld [vmem:[%s182_s8 + $0x40] sm:$0xff] (%p84_p4)  ;;  %v205_v7 = vld [vmem:[%s182_s8 + $0x48] sm:$0xff] (%p84_p4)  ;;  %202 = vst [vmem:[%s179_s9 + $0x18] sm:$0xff] (%p84_p4), %v201_v5 }
  0x1a   : > { %204 = vst [vmem:[%s179_s9 + $0x20] sm:$0xff] (%p84_p4), %v203_v6  ;;  %206 = vst [vmem:[%s179_s9 + $0x28] sm:$0xff] (%p84_p4), %v205_v7  ;;  %v207_v8 = vld [vmem:[%s182_s8 + $0x60] sm:$0xff] (%p84_p4)  ;;  %v209_v9 = vld [vmem:[%s182_s8 + $0x68] sm:$0xff] (%p84_p4) }
  0x1b   : > { %208 = vst [vmem:[%s179_s9 + $0x30] sm:$0xff] %v207_v8  ;;  %210 = vst [vmem:[%s179_s9 + $0x38] sm:$0xff] %v209_v9 }
  0x1c PF: > { %p2604_p7 = scmp.ge.s32.totalorder %s3386_s22, 1  ;;  %p215_p8 = scmp.lt.s32.totalorder %s3386_s22, 3 }
  0x1e   : > { %p216_p9 = pnand %p2604_p7, %p215_p8 }
  0x20   : > { %219 = sbr.rel (%p216_p9) target bundleno = 442 (0x1ba), region = 51 }
  0x27   : > { %s2608_s10 = sshll.u32 %s3441_s3, 1  ;;  %v3471_v10 = vpack.c.bf16 %v3423_v1, %v3423_v1  ;;  %v3388_v11 = vmov 0   ;;  %v3205_v12 = vld [vmem:[%s3755_s0 + $0x4] ss:$12 sps:$4 sm:$0xff]   ;;  %v1441_v43 = vlaneseq  ;;  %s222_s28 = sand.u32 1, %s3378_s20  }
  0x28   : > { %p256_p10 = scmp.lt.s32.totalorder %s2608_s10, 3  ;;  %2122 = vmatprep.mubr.bf16.mxu0 %v3388_v11  ;;  %2009 = vmatprep.mubr.bf16.mxu1 %v3205_v12  ;;  %s3660_s29 = sshll.u32 %s222_s28, 6 }
  0x29   : > { %v1442_v52 = vshrl.u32 %v1441_v43, 7  ;;  %s3667_s20 = scalar_lea.vmem [#allocation7], %s3660_s29  ;;  %s3687_s30 = scalar_lea.vmem [#allocation9], %s3660_s29 }
  0x2a   : > { %s3766_s10 = smov (!%p256_p10, %s2608_s10), 3  ;;  %s3707_s6 = scalar_lea.vmem [#allocation8], %s3660_s29 }
  0x2b   : > { %s2609_s13 = sshll.u32 %s3766_s10, 2  ;;  %v1443_v61 = vadd.s32 320, %v1442_v52  ;;  %v3211_v52 = vld [vmem:[%s3755_s0 + $0x34] ss:$12 sps:$4 sm:$0xff]   ;;  %s2796_s7 = sshll.u32 (%p3456_p5), %s3441_s3, 4 }
  0x2c   : > { %s3480_s16 = scalar_lea.vmem %s3757_s2, %s2609_s13  ;;  %s2432_s10 = scalar_lea.vmem (%p3456_p5), %s3759_s4, %s2796_s7 }
  0x2d   : > { %v264_v13 = vld [vmem:[%s3480_s16] sm:$0xff]   ;;  %v3125_v14 = vld [vmem:[%s3480_s16 + $0x10] sm:$0xff]   ;;  %vm1444_vm0 = vcmp.lt.s32.totalorder %v1443_v61, 325  ;;  %v3223_v61 = vld [vmem:[%s3755_s0 + $0x7c] ss:$12 sps:$4 sm:$0xff]  }
  0x2e   : > { %274 = vst [vmem:[#allocation10] sm:$0xff] %v264_v13   ;;  %v3126_v15 = vld [vmem:[%s3480_s16 + $0x20] sm:$0xff]   ;;  %v3127_v16 = vld [vmem:[%s3480_s16 + $0x30] sm:$0xff]  }
  0x2f   : > { %v3130_v17 = vld [vmem:[%s3480_s16 + $0x40] sm:$0xff]   ;;  %v3131_v18 = vld [vmem:[%s3480_s16 + $0x50] sm:$0xff]   ;;  %v2718_v25 = vcombine.high %v3126_v15, %v3127_v16  ;;  %v2717_v29 = vcombine.low %v3126_v15, %v3127_v16 }
  0x30   : > { %v3134_v19 = vld [vmem:[%s3480_s16 + $0x60] sm:$0xff]   ;;  %v3135_v20 = vld [vmem:[%s3480_s16 + $0x70] sm:$0xff]   ;;  %v2720_v31 = vcombine.high %v3130_v17, %v3131_v18  ;;  %v2719_v35 = vcombine.low %v3130_v17, %v3131_v18 }
  0x31   : > { %v3138_v22 = vld [vmem:[%s3480_s16 + $0x80] sm:$0xff]   ;;  %v3139_v26 = vld [vmem:[%s3480_s16 + $0x90] sm:$0xff]   ;;  %v2722_v37 = vcombine.high %v3134_v19, %v3135_v20  ;;  %v2721_v44 = vcombine.low %v3134_v19, %v3135_v20  ;;  %v3389_v19 = vmov 0.0  }
  0x32   : > { %v3142_v27 = vld [vmem:[%s3480_s16 + $0xa0] sm:$0xff]   ;;  %v3143_v28 = vld [vmem:[%s3480_s16 + $0xb0] sm:$0xff]   ;;  %v2724_v46 = vcombine.high %v3138_v22, %v3139_v26  ;;  %v2723_v53 = vcombine.low %v3138_v22, %v3139_v26 }
  0x33   : > { %v3495_v30 = vld [vmem:[%s3480_s16 + $0xc0] sm:$0xff]   ;;  %v3498_v32 = vld [vmem:[%s3480_s16 + $0xd0] sm:$0xff]   ;;  %v2726_v55 = vcombine.high %v3142_v27, %v3143_v28  ;;  %v2725_v62 = vcombine.low %v3142_v27, %v3143_v28 }
  0x34   : > { %v3501_v33 = vld [vmem:[%s3480_s16 + $0xe0] sm:$0xff]   ;;  %v3504_v34 = vld [vmem:[%s3480_s16 + $0xf0] sm:$0xff]   ;;  %v2728_v0 = vcombine.high %v3495_v30, %v3498_v32  ;;  %v2727_v8 = vcombine.low %v3495_v30, %v3498_v32 }
  0x35   : > { %v1561_v21 = vld [vmem:[#allocation10] sm:$0xff]  ;;  %v3155_v38 = vld [vmem:[%s3480_s16 + $0x210] sm:$0xff]  }
  0x36   : > { %v2716_v23 = vcombine.high %v1561_v21, %v3125_v14  ;;  %v2715_v24 = vcombine.low %v1561_v21, %v3125_v14  ;;  %v3154_v36 = vld [vmem:[%s3480_s16 + $0x200] sm:$0xff]   ;;  %v3512_v42 = vld [vmem:[%s3480_s16 + $0x110] sm:$0xff]   ;;  %v2730_v14 = vcombine.high %v3501_v33, %v3504_v34 }
  0x37   : > { %v3509_v39 = vld [vmem:[%s3480_s16 + $0x100] sm:$0xff]   ;;  %v2748_v40 = vcombine.high %v3154_v36, %v3155_v38  ;;  %v2747_v41 = vcombine.low %v3154_v36, %v3155_v38  ;;  %v3163_v47 = vld [vmem:[%s3480_s16 + $0x230] sm:$0xff]  }
  0x38   : > { %1977 = vmatprep.subr.bf16.mxu1 %v2716_v23  ;;  %v3162_v45 = vld [vmem:[%s3480_s16 + $0x220] sm:$0xff]   ;;  %v3520_v51 = vld [vmem:[%s3480_s16 + $0x130] sm:$0xff]   ;;  %v2729_v23 = vcombine.low %v3501_v33, %v3504_v34 }
  0x39   : > { %1978 = vmatpush1.bf16.msra.mxu1 %v2715_v24  ;;  %2090 = vmatprep.subr.bf16.mxu0 %v2748_v40  ;;  %v3517_v48 = vld [vmem:[%s3480_s16 + $0x120] sm:$0xff]   ;;  %v2750_v49 = vcombine.high %v3162_v45, %v3163_v47  ;;  %v2749_v50 = vcombine.low %v3162_v45, %v3163_v47  ;;  %v3171_v56 = vld [vmem:[%s3480_s16 + $0x250] sm:$0xff]  }
  0x3a   : > { %1979 = vmatprep.subr.bf16.mxu1 %v2718_v25  ;;  %2091 = vmatpush1.bf16.msra.mxu0 %v2747_v41  ;;  %v3170_v54 = vld [vmem:[%s3480_s16 + $0x240] sm:$0xff]   ;;  %v3175_v60 = vld [vmem:[%s3480_s16 + $0x150] sm:$0xff]   ;;  %v2732_v25 = vcombine.high %v3509_v39, %v3512_v42  ;;  %v2734_v30 = vcombine.high %v3517_v48, %v3520_v51 }
  0x3b   : > { %2092 = vmatprep.subr.bf16.mxu0 %v2750_v49  ;;  %v3525_v57 = vld [vmem:[%s3480_s16 + $0x140] sm:$0xff]   ;;  %v2752_v58 = vcombine.high %v3170_v54, %v3171_v56  ;;  %v2751_v59 = vcombine.low %v3170_v54, %v3171_v56  ;;  %v3179_v2 = vld [vmem:[%s3480_s16 + $0x270] sm:$0xff]   ;;  %v3207_v49 = vld [vmem:[%s3755_s0 + $0x1c] ss:$12 sps:$4 sm:$0xff]  }
  0x3c   : > { %v3178_v63 = vld [vmem:[%s3480_s16 + $0x260] sm:$0xff]   ;;  %v3183_v6 = vld [vmem:[%s3480_s16 + $0x170] sm:$0xff]   ;;  %v2736_v33 = vcombine.high %v3525_v57, %v3175_v60  ;;  %v2735_v36 = vcombine.low %v3525_v57, %v3175_v60 }
  0x3d   : > { %1980 = vmatpush1.bf16.msra.mxu1 %v2717_v29  ;;  %v3182_v3 = vld [vmem:[%s3480_s16 + $0x160] sm:$0xff]   ;;  %v2754_v4 = vcombine.high %v3178_v63, %v3179_v2  ;;  %v2753_v5 = vcombine.low %v3178_v63, %v3179_v2  ;;  %v3187_v15 = vld [vmem:[%s3480_s16 + $0x190] sm:$0xff]   ;;  %v2731_v29 = vcombine.low %v3509_v39, %v3512_v42 }
  0x3e   : > { %1981 = vmatprep.subr.bf16.mxu1 %v2720_v31  ;;  %2093 = vmatpush1.bf16.msra.mxu0 %v2749_v50  ;;  %v2689_v7 = vld [vmem:[%s3480_s16 + $0x280] sm:$0xff]   ;;  %v3191_v22 = vld [vmem:[%s3480_s16 + $0x1b0] sm:$0xff]   ;;  %v2733_v31 = vcombine.low %v3517_v48, %v3520_v51  ;;  %v2737_v38 = vcombine.low %v3182_v3, %v3183_v6 }
  0x3f   : > { %2094 = vmatprep.subr.bf16.mxu0 %v2752_v58  ;;  %v1439_v9 = vunpack.c.l.bf16 %v2689_v7  ;;  %v1461_v12 = vunpack.c.h.bf16 %v2689_v7  ;;  %v3186_v13 = vld [vmem:[%s3480_s16 + $0x180] sm:$0xff]   ;;  %v3195_v26 = vld [vmem:[%s3480_s16 + $0x1d0] sm:$0xff]  }
  0x40   : > { %v3190_v18 = vld [vmem:[%s3480_s16 + $0x1a0] sm:$0xff]   ;;  %v3199_v28 = vld [vmem:[%s3480_s16 + $0x1f0] sm:$0xff]   ;;  %v2740_v39 = vcombine.high %v3186_v13, %v3187_v15  ;;  %v2739_v40 = vcombine.low %v3186_v13, %v3187_v15 }
  0x41   : > { %1982 = vmatpush1.bf16.msra.mxu1 %v2719_v35  ;;  %v1445_v16 = vsel %vm1444_vm0, %v1439_v9, %v3423_v1  ;;  %v1467_v17 = vsel %vm1444_vm0, %v1461_v12, %v3423_v1  ;;  %v3194_v24 = vld [vmem:[%s3480_s16 + $0x1c0] sm:$0xff]   ;;  %v2742_v41 = vcombine.high %v3190_v18, %v3191_v22  ;;  %v3202_v42 = vld [vmem:[%s3755_s0 + $0x8] ss:$12 sps:$4 sm:$0xff]   ;;  %v2741_v43 = vcombine.low %v3190_v18, %v3191_v22  ;;  %v3213_v54 = vld [vmem:[%s3755_s0 + $0x30] ss:$12 sps:$4 sm:$0xff]  }
  0x42   : > { %1983 = vmatprep.subr.bf16.mxu1 %v2722_v37  ;;  %2095 = vmatpush1.bf16.msra.mxu0 %v2751_v59  ;;  %v1447_v20 = vpack.c.bf16 %v3389_v19, %v1445_v16  ;;  %v1469_v21 = vpack.c.bf16 %v3389_v19, %v1467_v17  ;;  %v3198_v27 = vld [vmem:[%s3480_s16 + $0x1e0] sm:$0xff]   ;;  %v2738_v37 = vcombine.high %v3182_v3, %v3183_v6  ;;  %v3218_v56 = vld [vmem:[%s3755_s0 + $0x68] ss:$12 sps:$4 sm:$0xff]   ;;  %v3230_v2 = vld [vmem:[%s3755_s0 + $0xb0] ss:$12 sps:$4 sm:$0xff]  }
  0x43   : > { %2096 = vmatprep.subr.bf16.mxu0 %v2754_v4  ;;  %v2743_v45 = vcombine.low %v3194_v24, %v3195_v26  ;;  %v3206_v47 = vld [vmem:[%s3755_s0 + $0x20] ss:$12 sps:$4 sm:$0xff]   ;;  %v2745_v48 = vcombine.low %v3198_v27, %v3199_v28  ;;  %v3210_v50 = vld [vmem:[%s3755_s0 + $0x38] ss:$12 sps:$4 sm:$0xff]   ;;  %v3217_v57 = vld [vmem:[%s3755_s0 + $0x48] ss:$12 sps:$4 sm:$0xff]  }
  0x44   : > { %1449 = vst [vmem:[#allocation10 + $0x140] sm:$0xf] %v1447_v20  ;;  %1471 = vst [vmem:[#allocation10 + $0x144] sm:$0xf] %v1469_v21  ;;  %v3209_v51 = vld [vmem:[%s3755_s0 + $0x18] ss:$12 sps:$4 sm:$0xff]  }
  0x45   : > { %1984 = vmatpush1.bf16.msra.mxu1 %v2721_v44  ;;  %v2744_v44 = vcombine.high %v3194_v24, %v3195_v26  ;;  %v3219_v58 = vld [vmem:[%s3755_s0 + $0x64] ss:$12 sps:$4 sm:$0xff]   ;;  %v3222_v59 = vld [vmem:[%s3755_s0 + $0x80] ss:$12 sps:$4 sm:$0xff]  }
  0x46   : > { %1985 = vmatprep.subr.bf16.mxu1 %v2724_v46  ;;  %2097 = vmatpush1.bf16.msra.mxu0 %v2753_v5  ;;  %v2746_v46 = vcombine.high %v3198_v27, %v3199_v28  ;;  %v3221_v60 = vld [vmem:[%s3755_s0 + $0x60] ss:$12 sps:$4 sm:$0xff]   ;;  %v3225_v63 = vld [vmem:[%s3755_s0 + $0x78] ss:$12 sps:$4 sm:$0xff]   ;;  %v3229_v3 = vld [vmem:[%s3755_s0 + $0x90] ss:$12 sps:$4 sm:$0xff]  }
  0x47   : > { %v3231_v4 = vld [vmem:[%s3755_s0 + $0xac] ss:$12 sps:$4 sm:$0xff]  }
  0x49   : > { %1986 = vmatpush1.bf16.msra.mxu1 %v2723_v53  ;;  %v3214_v53 = vld [vmem:[%s3755_s0 + $0x50] ss:$12 sps:$4 sm:$0xff]  }
  0x4a   : > { %1987 = vmatprep.subr.bf16.mxu1 %v2726_v55  ;;  %v3215_v55 = vld [vmem:[%s3755_s0 + $0x4c] ss:$12 sps:$4 sm:$0xff]  }
  0x4b   : > { %v1601_v32 = vld [vmem:[#allocation10 + $0x140] sm:$0xff] }
  0x4c   : > { %v2756_v34 = vcombine.high %v1601_v32, %v3471_v10  ;;  %v2755_v35 = vcombine.low %v1601_v32, %v3471_v10 }
  0x4d   : > { %1988 = vmatpush1.bf16.msra.mxu1 %v2725_v62  ;;  %v3226_v62 = vld [vmem:[%s3755_s0 + $0x98] ss:$12 sps:$4 sm:$0xff]  }
  0x4e   : > { %1989 = vmatprep.subr.bf16.mxu1 %v2728_v0  ;;  %2098 = vmatprep.subr.bf16.mxu0 %v2756_v34  ;;  %v3227_v0 = vld [vmem:[%s3755_s0 + $0x94] ss:$12 sps:$4 sm:$0xff]  }
  0x4f   : > { %2099 = vmatpush1.bf16.msra.mxu0 %v2755_v35 }
  0x50   : > { %2100 = vmatprep.subr.bf16.mxu0 %v3471_v10 }
  0x51   : > { %1990 = vmatpush1.bf16.msra.mxu1 %v2727_v8 }
  0x52   : > { %1991 = vmatprep.subr.bf16.mxu1 %v2730_v14 }
  0x53   : > { %2101 = vmatpush1.bf16.msra.mxu0 %v3471_v10 }
  0x54   : > { %2102 = vmatprep.subr.bf16.mxu0 %v3471_v10 }
  0x55   : > { %1992 = vmatpush1.bf16.msra.mxu1 %v2729_v23 }
  0x56   : > { %1993 = vmatprep.subr.bf16.mxu1 %v2732_v25 }
  0x57   : > { %2103 = vmatpush1.bf16.msra.mxu0 %v3471_v10 }
  0x58   : > { %2104 = vmatprep.subr.bf16.mxu0 %v3471_v10 }
  0x59   : > { %1994 = vmatpush1.bf16.msra.mxu1 %v2731_v29 }
  0x5a   : > { %1995 = vmatprep.subr.bf16.mxu1 %v2734_v30 }
  0x5b   : > { %2105 = vmatpush1.bf16.msra.mxu0 %v3471_v10  ;;  %v3203_v10 = vld [vmem:[%s3755_s0] ss:$12 sps:$4 sm:$0xff]  }
  0x5d   : > { %1996 = vmatpush1.bf16.msra.mxu1 %v2733_v31 }
  0x5e   : > { %1997 = vmatprep.subr.bf16.mxu1 %v2736_v33  ;;  %2123 = vmatmul.mubr.bf16.vlgmr.msra.gmra.mrb[0].mxu0 %v3202_v42 }
  0x5f   : > { %2132 = vmatprep.mubr.bf16.mxu0 %v3388_v11 }
  0x61   : > { %1998 = vmatpush1.bf16.msra.mxu1 %v2735_v36 }
  0x62   : > { %1999 = vmatprep.subr.bf16.mxu1 %v2738_v37 }
  0x65   : > { %2000 = vmatpush1.bf16.msra.mxu1 %v2737_v38 }
  0x66   : > { %2001 = vmatprep.subr.bf16.mxu1 %v2740_v39  ;;  %2133 = vmatmul.mubr.bf16.gmra.mrb[4].mxu0 %v3206_v47 }
  0x67   : > { %2142 = vmatprep.mubr.bf16.mxu0 %v3388_v11 }
  0x69   : > { %2002 = vmatpush1.bf16.msra.mxu1 %v2739_v40 }
  0x6a   : > { %2003 = vmatprep.subr.bf16.mxu1 %v2742_v41 }
  0x6d   : > { %2004 = vmatpush1.bf16.msra.mxu1 %v2741_v43 }
  0x6e   : > { %2005 = vmatprep.subr.bf16.mxu1 %v2744_v44  ;;  %2143 = vmatmul.mubr.bf16.gmra.mrb[8].mxu0 %v3210_v50 }
  0x6f   : > { %2152 = vmatprep.mubr.bf16.mxu0 %v3388_v11 }
  0x71   : > { %2006 = vmatpush1.bf16.msra.mxu1 %v2743_v45 }
  0x72   : > { %2007 = vmatprep.subr.bf16.mxu1 %v2746_v46 }
  0x75   : > { %2008 = vmatpush1.bf16.msra.mxu1 %v2745_v48 }
  0x76   : > { %2153 = vmatmul.mubr.bf16.gmra.mrb[12].mxu0 %v3214_v53 }
  0x77   : > { %2162 = vmatprep.mubr.bf16.mxu0 %v3388_v11 }
  0x78   : > { %2010 = vmatmul.mubr.bf16.vlgmr.msra.gmra.mrb[0].mxu1 %v3203_v10 }
  0x79   : > { %2019 = vmatprep.mubr.bf16.mxu1 %v3207_v49 }
  0x7e   : > { %2163 = vmatmul.mubr.bf16.gmra.mrb[16].mxu0 %v3218_v56 }
  0x7f   : > { %2172 = vmatprep.mubr.bf16.mxu0 %v3388_v11 }
  0x80   : > { %2020 = vmatmul.mubr.bf16.gmra.mrb[4].mxu1 %v3209_v51 }
  0x81   : > { %2029 = vmatprep.mubr.bf16.mxu1 %v3211_v52 }
  0x86   : > { %2173 = vmatmul.mubr.bf16.gmra.mrb[20].mxu0 %v3222_v59 }
  0x87   : > { %2182 = vmatprep.mubr.bf16.mxu0 %v3388_v11 }
  0x88   : > { %2030 = vmatmul.mubr.bf16.gmra.mrb[8].mxu1 %v3213_v54 }
  0x89   : > { %2039 = vmatprep.mubr.bf16.mxu1 %v3215_v55 }
  0x8e   : > { %2183 = vmatmul.mubr.bf16.gmra.mrb[24].mxu0 %v3226_v62 }
  0x8f   : > { %2192 = vmatprep.mubr.bf16.mxu0 %v3388_v11  ;;  %v3233_v11 = vld [vmem:[%s3755_s0 + $0xa8] ss:$12 sps:$4 sm:$0xff]  }
  0x90   : > { %2040 = vmatmul.mubr.bf16.gmra.mrb[12].mxu1 %v3217_v57 }
  0x91   : > { %2049 = vmatprep.mubr.bf16.mxu1 %v3219_v58 }
  0x96   : > { %2193 = vmatmul.mubr.bf16.gmra.mrb[28].mxu0 %v3230_v2 }
  0x98   : > { %2050 = vmatmul.mubr.bf16.gmra.mrb[16].mxu1 %v3221_v60 }
  0x99   : > { %2059 = vmatprep.mubr.bf16.mxu1 %v3223_v61 }
  0xa0   : > { %2060 = vmatmul.mubr.bf16.gmra.mrb[20].mxu1 %v3225_v63 }
  0xa1   : > { %2069 = vmatprep.mubr.bf16.mxu1 %v3227_v0 }
  0xa8   : > { %2070 = vmatmul.mubr.bf16.gmra.mrb[24].mxu1 %v3229_v3 }
  0xa9   : > { %2079 = vmatprep.mubr.bf16.mxu1 %v3231_v4 }
  0xb0   : > { %2080 = vmatmul.mubr.bf16.gmra.mrb[28].mxu1 %v3233_v11 }
 0x131   : > { %v2124_v5 = vpop.f32.mrb[0].mxu0 }
 0x132   : > { %v2126_v6 = vpop.f32.mrb[1].mxu0 }
 0x133   : > { %v2128_v7 = vpop.f32.mrb[2].mxu0 }
 0x134   : > { %v2130_v8 = vpop.f32.mrb[3].mxu0 }
 0x139   : > { %v2134_v9 = vpop.f32.mrb[4].mxu0 }
 0x13a   : > { %v2136_v12 = vpop.f32.mrb[5].mxu0 }
 0x13b   : > { %v2138_v13 = vpop.f32.mrb[6].mxu0 }
 0x13c   : > { %v2140_v14 = vpop.f32.mrb[7].mxu0 }
 0x141   : > { %v2144_v25 = vpop.f32.mrb[8].mxu0 }
 0x142   : > { %v2146_v27 = vpop.f32.mrb[9].mxu0 }
 0x143   : > { %v2148_v29 = vpop.f32.mrb[10].mxu0 }
 0x144   : > { %v2150_v30 = vpop.f32.mrb[11].mxu0 }
 0x149   : > { %v2154_v41 = vpop.f32.mrb[12].mxu0 }
 0x14a   : > { %v2156_v43 = vpop.f32.mrb[13].mxu0 }
 0x14b   : > { %v2011_v15 = vpop.f32.mrb[0].mxu1  ;;  %v2158_v45 = vpop.f32.mrb[14].mxu0 }
 0x14c   : > { %v2125_v16 = vadd.f32 %v2124_v5, %v2011_v15  ;;  %v2013_v17 = vpop.f32.mrb[1].mxu1  ;;  %v2160_v47 = vpop.f32.mrb[15].mxu0 }
 0x14d   : > { %v2127_v18 = vadd.f32 %v2126_v6, %v2013_v17  ;;  %v2015_v19 = vpop.f32.mrb[2].mxu1 }
 0x14e   : > { %v2763_v20 = vmul.f32 -1.442695, %v2125_v16  ;;  %v2129_v21 = vadd.f32 %v2128_v7, %v2015_v19  ;;  %v2017_v22 = vpop.f32.mrb[3].mxu1 }
 0x14f   : > { %v2764_v23 = vmul.f32 -1.442695, %v2127_v18  ;;  %v2131_v24 = vadd.f32 %v2130_v8, %v2017_v22 }
 0x150   : > { %3234 = vpow2.f32 %v2763_v20  ;;  %v2765_v26 = vmul.f32 -1.442695, %v2129_v21 }
 0x151   : > { %3236 = vpow2.f32 %v2764_v23  ;;  %v2766_v28 = vmul.f32 -1.442695, %v2131_v24  ;;  %v2164_v63 = vpop.f32.mrb[16].mxu0 }
 0x152   : > { %3238 = vpow2.f32 %v2765_v26  ;;  %v2166_v2 = vpop.f32.mrb[17].mxu0 }
 0x153   : > { %v2021_v31 = vpop.f32.mrb[4].mxu1  ;;  %3240 = vpow2.f32 %v2766_v28  ;;  %v2168_v11 = vpop.f32.mrb[18].mxu0 }
 0x154   : > { %v2135_v32 = vadd.f32 %v2134_v9, %v2021_v31  ;;  %v2023_v33 = vpop.f32.mrb[5].mxu1  ;;  %v2170_v6 = vpop.f32.mrb[19].mxu0 }
 0x155   : > { %v2137_v34 = vadd.f32 %v2136_v12, %v2023_v33  ;;  %v2025_v35 = vpop.f32.mrb[6].mxu1 }
 0x156   : > { %v2767_v36 = vmul.f32 -1.442695, %v2135_v32  ;;  %v2139_v37 = vadd.f32 %v2138_v13, %v2025_v35  ;;  %v2027_v38 = vpop.f32.mrb[7].mxu1 }
 0x157   : > { %v2768_v39 = vmul.f32 -1.442695, %v2137_v34  ;;  %v2141_v40 = vadd.f32 %v2140_v14, %v2027_v38 }
 0x158   : > { %3242 = vpow2.f32 %v2767_v36  ;;  %v2769_v42 = vmul.f32 -1.442695, %v2139_v37 }
 0x159   : > { %3244 = vpow2.f32 %v2768_v39  ;;  %v2770_v44 = vmul.f32 -1.442695, %v2141_v40 }
 0x15a   : > { %v3235_v46 = vpop.eup %3234  ;;  %3246 = vpow2.f32 %v2769_v42 }
 0x15b   : > { %v3237_v48 = vpop.eup %3236  ;;  %v2227_v10 = vadd.f32 1.0, %v3235_v46  ;;  %v2031_v49 = vpop.f32.mrb[8].mxu1  ;;  %3248 = vpow2.f32 %v2770_v44 }
 0x15c   : > { %v3239_v50 = vpop.eup %3238  ;;  %v2228_v51 = vadd.f32 1.0, %v3237_v48  ;;  %v2145_v52 = vadd.f32 %v2144_v25, %v2031_v49  ;;  %v2033_v53 = vpop.f32.mrb[9].mxu1 }
 0x15d   : > { %v2229_v54 = vadd.f32 1.0, %v3239_v50  ;;  %v2147_v55 = vadd.f32 %v2146_v27, %v2033_v53  ;;  %v2035_v56 = vpop.f32.mrb[10].mxu1  ;;  %v3241_v57 = vpop.eup %3240  ;;  %3250 = vrcp.f32 %v2227_v10 }
 0x15e   : > { %v2771_v58 = vmul.f32 -1.442695, %v2145_v52  ;;  %v2149_v59 = vadd.f32 %v2148_v29, %v2035_v56  ;;  %v2037_v60 = vpop.f32.mrb[11].mxu1  ;;  %3252 = vrcp.f32 %v2228_v51  ;;  %v2230_v3 = vadd.f32 1.0, %v3241_v57  ;;  %v2174_v25 = vpop.f32.mrb[20].mxu0 }
 0x15f   : > { %v2772_v61 = vmul.f32 -1.442695, %v2147_v55  ;;  %v2151_v62 = vadd.f32 %v2150_v30, %v2037_v60  ;;  %3254 = vrcp.f32 %v2229_v54  ;;  %v2176_v28 = vpop.f32.mrb[21].mxu0 }
 0x160   : > { %v2773_v0 = vmul.f32 -1.442695, %v2149_v59  ;;  %3256 = vpow2.f32 %v2771_v58  ;;  %v2178_v32 = vpop.f32.mrb[22].mxu0 }
 0x161   : > { %v2774_v4 = vmul.f32 -1.442695, %v2151_v62  ;;  %3258 = vpow2.f32 %v2772_v61  ;;  %v2180_v34 = vpop.f32.mrb[23].mxu0 }
 0x162   : > { %v3243_v5 = vpop.eup %3242  ;;  %3260 = vpow2.f32 %v2773_v0  ;;  %v2184_v51 = vpop.f32.mrb[24].mxu0 }
 0x163   : > { %v3245_v7 = vpop.eup %3244  ;;  %v2231_v8 = vadd.f32 1.0, %v3243_v5  ;;  %v2041_v9 = vpop.f32.mrb[12].mxu1  ;;  %3262 = vpow2.f32 %v2774_v4 }
 0x164   : > { %v3247_v12 = vpop.eup %3246  ;;  %v2232_v13 = vadd.f32 1.0, %v3245_v7  ;;  %v2155_v14 = vadd.f32 %v2154_v41, %v2041_v9  ;;  %v2043_v15 = vpop.f32.mrb[13].mxu1  ;;  %3264 = vrcp.f32 %v2230_v3 }
 0x165   : > { %v2233_v16 = vadd.f32 1.0, %v3247_v12  ;;  %v2157_v17 = vadd.f32 %v2156_v43, %v2043_v15  ;;  %v2045_v18 = vpop.f32.mrb[14].mxu1  ;;  %v3249_v19 = vpop.eup %3248  ;;  %3266 = vrcp.f32 %v2231_v8  ;;  %v2299_v15 = vld [vmem:[%s3667_s20] sm:$0xff] }
 0x166   : > { %v2775_v20 = vmul.f32 -1.442695, %v2155_v14  ;;  %v2159_v21 = vadd.f32 %v2158_v45, %v2045_v18  ;;  %v2047_v22 = vpop.f32.mrb[15].mxu1  ;;  %3268 = vrcp.f32 %v2232_v13  ;;  %v2234_v30 = vadd.f32 1.0, %v3249_v19  ;;  %v2186_v53 = vpop.f32.mrb[25].mxu0  ;;  %v2300_v18 = vld [vmem:[%s3667_s20 + $0x8] sm:$0xff] }
 0x167   : > { %v2776_v23 = vmul.f32 -1.442695, %v2157_v17  ;;  %v2161_v24 = vadd.f32 %v2160_v47, %v2047_v22  ;;  %v3645_v26 = vpop.eup %3250  ;;  %3270 = vrcp.f32 %v2233_v16  ;;  %v2188_v55 = vpop.f32.mrb[26].mxu0 }
 0x168   : > { %v2777_v27 = vmul.f32 -1.442695, %v2159_v21  ;;  %v3647_v29 = vpop.eup %3252  ;;  %3272 = vpow2.f32 %v2775_v20  ;;  %v2190_v57 = vpop.f32.mrb[27].mxu0  ;;  %v2301_v21 = vld [vmem:[%s3667_s20 + $0x10] sm:$0xff] }
 0x169   : > { %v2778_v31 = vmul.f32 -1.442695, %v2161_v24  ;;  %v3649_v33 = vpop.eup %3254  ;;  %3274 = vpow2.f32 %v2776_v23  ;;  %v3664_v13 = vpop.f32.mrb[28].mxu0 }
 0x16a   : > { %v3257_v35 = vpop.eup %3256  ;;  %3276 = vpow2.f32 %v2777_v27  ;;  %v3670_v16 = vpop.f32.mrb[29].mxu0 }
 0x16b   : > { %v2051_v36 = vpop.f32.mrb[16].mxu1  ;;  %v3259_v37 = vpop.eup %3258  ;;  %v2275_v38 = vadd.f32 1.0, %v3257_v35  ;;  %3278 = vpow2.f32 %v2778_v31 }
 0x16c   : > { %v2165_v39 = vadd.f32 %v2164_v63, %v2051_v36  ;;  %v2053_v40 = vpop.f32.mrb[17].mxu1  ;;  %v3261_v41 = vpop.eup %3260  ;;  %3280 = vrcp.f32 %v2234_v30  ;;  %v2276_v42 = vadd.f32 1.0, %v3259_v37 }
 0x16d   : > { %v2167_v43 = vadd.f32 %v2166_v2, %v2053_v40  ;;  %v2055_v44 = vpop.f32.mrb[18].mxu1  ;;  %v3263_v45 = vpop.eup %3262  ;;  %3282 = vrcp.f32 %v2275_v38  ;;  %v2277_v46 = vadd.f32 1.0, %v3261_v41 }
 0x16e   : > { %v2169_v47 = vadd.f32 %v2168_v11, %v2055_v44  ;;  %v2057_v48 = vpop.f32.mrb[19].mxu1  ;;  %v3651_v10 = vpop.eup %3264  ;;  %3284 = vrcp.f32 %v2276_v42  ;;  %v2278_v49 = vadd.f32 1.0, %v3263_v45 }
 0x16f   : > { %v2171_v50 = vadd.f32 %v2170_v6, %v2057_v48  ;;  %v3654_v52 = vpop.eup %3266  ;;  %3286 = vrcp.f32 %v2277_v46  ;;  %v3673_v19 = vpop.f32.mrb[30].mxu0 }
 0x170   : > { %v3656_v54 = vpop.eup %3268  ;;  %3288 = vrcp.f32 %v2278_v49  ;;  %v3676_v22 = vpop.f32.mrb[31].mxu0  ;;  %v2303_v49 = vld [vmem:[%s3667_s20 + $0x20] sm:$0xff] }
 0x171   : > { %v3658_v56 = vpop.eup %3270  ;;  %3290 = vtanh.f32 %v2165_v39 }
 0x172   : > { %v3273_v58 = vpop.eup %3272  ;;  %3292 = vtanh.f32 %v2167_v43 }
 0x173   : > { %v2061_v59 = vpop.f32.mrb[20].mxu1  ;;  %v3275_v60 = vpop.eup %3274  ;;  %v2279_v61 = vadd.f32 1.0, %v3273_v58  ;;  %3294 = vtanh.f32 %v2169_v47  ;;  %v2304_v58 = vld [vmem:[%s3667_s20 + $0x28] sm:$0xff] }
 0x174   : > { %v2175_v62 = vadd.f32 %v2174_v25, %v2061_v59  ;;  %v2063_v63 = vpop.f32.mrb[21].mxu1  ;;  %v3277_v0 = vpop.eup %3276  ;;  %v2280_v2 = vadd.f32 1.0, %v3275_v60  ;;  %3296 = vtanh.f32 %v2171_v50  ;;  %v2302_v25 = vld [vmem:[%s3667_s20 + $0x18] sm:$0xff]  ;;  %v2305_v59 = vld [vmem:[%s3667_s20 + $0x30] sm:$0xff] }
 0x175   : > { %v2177_v3 = vadd.f32 %v2176_v28, %v2063_v63  ;;  %v2065_v4 = vpop.f32.mrb[22].mxu1  ;;  %v3279_v11 = vpop.eup %3278  ;;  %3298 = vrcp.f32 %v2279_v61  ;;  %v2281_v5 = vadd.f32 1.0, %v3277_v0 }
 0x176   : > { %v2179_v6 = vadd.f32 %v2178_v32, %v2065_v4  ;;  %v2067_v7 = vpop.f32.mrb[23].mxu1  ;;  %v3662_v8 = vpop.eup %3280  ;;  %3300 = vrcp.f32 %v2280_v2  ;;  %v2282_v9 = vadd.f32 1.0, %v3279_v11 }
 0x177   : > { %v2181_v12 = vadd.f32 %v2180_v34, %v2067_v7  ;;  %v3283_v14 = vpop.eup %3282  ;;  %3302 = vrcp.f32 %v2281_v5 }
 0x178   : > { %v3285_v17 = vpop.eup %3284  ;;  %3304 = vrcp.f32 %v2282_v9  ;;  %v2307_v24 = vmul.f32 %v3283_v14, %v2299_v15 }
 0x179   : > { %v3287_v20 = vpop.eup %3286  ;;  %3306 = vtanh.f32 %v2175_v62  ;;  %v2308_v30 = vmul.f32 %v3285_v17, %v2300_v18 }
 0x17a   : > { %v3289_v23 = vpop.eup %3288  ;;  %3308 = vtanh.f32 %v2177_v3  ;;  %v2309_v35 = vmul.f32 %v3287_v20, %v2301_v21 }
 0x17b   : > { %v2071_v27 = vpop.f32.mrb[24].mxu1  ;;  %v3291_v28 = vpop.eup %3290  ;;  %3310 = vtanh.f32 %v2179_v6  ;;  %v2310_v40 = vmul.f32 %v3289_v23, %v2302_v25 }
 0x17c   : > { %v2185_v31 = vadd.f32 %v2184_v51, %v2071_v27  ;;  %v2073_v32 = vpop.f32.mrb[25].mxu1  ;;  %v3293_v34 = vpop.eup %3292  ;;  %v2323_v36 = vmul.f32 %v3291_v28, %v3645_v26  ;;  %3312 = vtanh.f32 %v2181_v12 }
 0x17d   : > { %v2187_v37 = vadd.f32 %v2186_v53, %v2073_v32  ;;  %v2075_v38 = vpop.f32.mrb[26].mxu1  ;;  %v3295_v39 = vpop.eup %3294  ;;  %v2324_v41 = vmul.f32 %v3293_v34, %v3647_v29 }
 0x17e   : > { %v2779_v42 = vmul.f32 -1.442695, %v2185_v31  ;;  %v2189_v43 = vadd.f32 %v2188_v55, %v2075_v38  ;;  %v2077_v44 = vpop.f32.mrb[27].mxu1  ;;  %v3297_v45 = vpop.eup %3296  ;;  %v2331_v46 = vadd.f32 %v2323_v36, %v2307_v24  ;;  %v2325_v47 = vmul.f32 %v3295_v39, %v3649_v33 }
 0x17f   : > { %v2191_v48 = vadd.f32 %v2190_v57, %v2077_v44  ;;  %v3299_v26 = vpop.eup %3298  ;;  %v2332_v50 = vadd.f32 %v2324_v41, %v2308_v30  ;;  %v2326_v51 = vmul.f32 %v3297_v45, %v3651_v10  ;;  %v2780_v55 = vmul.f32 -1.442695, %v2187_v37  ;;  %v2306_v57 = vld [vmem:[%s3667_s20 + $0x38] sm:$0xff] }
 0x180   : > { %3314 = vpow2.f32 %v2779_v42  ;;  %v3301_v53 = vpop.eup %3300  ;;  %2387 = vst [vmem:[%s3687_s30] sm:$0xff] %v2331_v46  ;;  %v2333_v29 = vadd.f32 %v2325_v47, %v2309_v35  ;;  %v2781_v61 = vmul.f32 -1.442695, %v2189_v43  ;;  %v2311_v10 = vmul.f32 %v3299_v26, %v2303_v49 }
 0x181   : > { %v3303_v33 = vpop.eup %3302  ;;  %2388 = vst [vmem:[%s3687_s30 + $0x8] sm:$0xff] %v2332_v50  ;;  %v2334_v60 = vadd.f32 %v2326_v51, %v2310_v40  ;;  %v2782_v63 = vmul.f32 -1.442695, %v2191_v48  ;;  %v2312_v3 = vmul.f32 %v3301_v53, %v2304_v58  ;;  %3316 = vpow2.f32 %v2780_v55 }
 0x182   : > { %v3305_v62 = vpop.eup %3304  ;;  %2389 = vst [vmem:[%s3687_s30 + $0x10] sm:$0xff] %v2333_v29  ;;  %v2313_v4 = vmul.f32 %v3303_v33, %v2305_v59  ;;  %3318 = vpow2.f32 %v2781_v61 }
 0x183   : > { %v2081_v0 = vpop.f32.mrb[28].mxu1  ;;  %v3307_v2 = vpop.eup %3306  ;;  %2390 = vst [vmem:[%s3687_s30 + $0x18] sm:$0xff] %v2334_v60  ;;  %v2314_v7 = vmul.f32 %v3305_v62, %v2306_v57  ;;  %3320 = vpow2.f32 %v2782_v63 }
 0x184   : > { %v2195_v11 = vadd.f32 %v3664_v13, %v2081_v0  ;;  %v2083_v5 = vpop.f32.mrb[29].mxu1  ;;  %v3309_v6 = vpop.eup %3308  ;;  %v2327_v9 = vmul.f32 %v3307_v2, %v3654_v52 }
 0x185   : > { %v2197_v12 = vadd.f32 %v3670_v16, %v2083_v5  ;;  %v2085_v14 = vpop.f32.mrb[30].mxu1  ;;  %v3311_v15 = vpop.eup %3310  ;;  %v2328_v17 = vmul.f32 %v3309_v6, %v3656_v54 }
 0x186   : > { %v2783_v18 = vmul.f32 -1.442695, %v2195_v11  ;;  %v2199_v20 = vadd.f32 %v3673_v19, %v2085_v14  ;;  %v2087_v21 = vpop.f32.mrb[31].mxu1  ;;  %v3313_v13 = vpop.eup %3312  ;;  %v2335_v23 = vadd.f32 %v2327_v9, %v2311_v10  ;;  %v2329_v24 = vmul.f32 %v3311_v15, %v3658_v56 }
 0x187   : > { %v2336_v52 = vadd.f32 %v2328_v17, %v2312_v3  ;;  %v2330_v16 = vmul.f32 %v3313_v13, %v3662_v8  ;;  %v2201_v25 = vadd.f32 %v3676_v22, %v2087_v21  ;;  %v2784_v28 = vmul.f32 -1.442695, %v2197_v12 }
 0x188   : > { %3322 = vpow2.f32 %v2783_v18  ;;  %2391 = vst [vmem:[%s3687_s30 + $0x20] sm:$0xff] %v2335_v23  ;;  %v2337_v54 = vadd.f32 %v2329_v24, %v2313_v4  ;;  %v2785_v56 = vmul.f32 -1.442695, %v2199_v20 }
 0x189   : > { %3324 = vtanh.f32 %v2331_v46  ;;  %2392 = vst [vmem:[%s3687_s30 + $0x28] sm:$0xff] %v2336_v52  ;;  %v2338_v19 = vadd.f32 %v2330_v16, %v2314_v7  ;;  %v2786_v31 = vmul.f32 -1.442695, %v2201_v25 }
 0x18a   : > { %v3315_v27 = vpop.eup %3314  ;;  %3326 = vtanh.f32 %v2332_v50  ;;  %2393 = vst [vmem:[%s3687_s30 + $0x30] sm:$0xff] %v2337_v54 }
 0x18b   : > { %3328 = vtanh.f32 %v2333_v29  ;;  %v2363_v30 = vadd.f32 1.0, %v3315_v27  ;;  %2394 = vst [vmem:[%s3687_s30 + $0x38] sm:$0xff] %v2338_v19  ;;  %v3317_v8 = vpop.eup %3316 }
 0x18c   : > { %3330 = vtanh.f32 %v2334_v60  ;;  %v3319_v32 = vpop.eup %3318  ;;  %v2364_v34 = vadd.f32 1.0, %v3317_v8 }
 0x18d   : > { %3332 = vrcp.f32 %v2363_v30  ;;  %v3321_v22 = vpop.eup %3320  ;;  %v2365_v35 = vadd.f32 1.0, %v3319_v32 }
 0x18e   : > { %3334 = vpow2.f32 %v2784_v28  ;;  %v2366_v37 = vadd.f32 1.0, %v3321_v22 }
 0x18f   : > { %3336 = vpow2.f32 %v2785_v56 }
 0x190   : > { %3338 = vpow2.f32 %v2786_v31 }
 0x191   : > { %3340 = vtanh.f32 %v2335_v23 }
 0x192   : > { %v3323_v36 = vpop.eup %3322  ;;  %3342 = vrcp.f32 %v2364_v34 }
 0x193   : > { %v3325_v38 = vpop.eup %3324  ;;  %3344 = vrcp.f32 %v2365_v35  ;;  %v2367_v39 = vadd.f32 1.0, %v3323_v36 }
 0x194   : > { %v3327_v40 = vpop.eup %3326  ;;  %3346 = vrcp.f32 %v2366_v37 }
 0x195   : > { %v3329_v41 = vpop.eup %3328  ;;  %3348 = vrcp.f32 %v2367_v39 }
 0x196   : > { %v3331_v42 = vpop.eup %3330  ;;  %3350 = vtanh.f32 %v2336_v52 }
 0x197   : > { %v3333_v43 = vpop.eup %3332  ;;  %3352 = vtanh.f32 %v2337_v54 }
 0x198   : > { %v3335_v44 = vpop.eup %3334  ;;  %v2403_v45 = vmul.f32 %v3333_v43, %v3325_v38  ;;  %3354 = vtanh.f32 %v2338_v19 }
 0x199   : > { %v3337_v46 = vpop.eup %3336  ;;  %v2368_v47 = vadd.f32 1.0, %v3335_v44 }
 0x19a   : > { %v3339_v48 = vpop.eup %3338  ;;  %2411 = vst [vmem:[%s3707_s6] sm:$0xff] %v2403_v45  ;;  %v2369_v26 = vadd.f32 1.0, %v3337_v46 }
 0x19b   : > { %v3341_v49 = vpop.eup %3340  ;;  %3356 = vrcp.f32 %v2368_v47  ;;  %v2370_v50 = vadd.f32 1.0, %v3339_v48 }
 0x19c   : > { %v3343_v51 = vpop.eup %3342  ;;  %3358 = vrcp.f32 %v2369_v26 }
 0x19d   : > { %v3345_v53 = vpop.eup %3344  ;;  %v2404_v58 = vmul.f32 %v3343_v51, %v3327_v40  ;;  %3360 = vrcp.f32 %v2370_v50 }
 0x19e   : > { %v3347_v59 = vpop.eup %3346  ;;  %v2405_v29 = vmul.f32 %v3345_v53, %v3329_v41 }
 0x19f   : > { %v3349_v55 = vpop.eup %3348  ;;  %2412 = vst [vmem:[%s3707_s6 + $0x8] sm:$0xff] %v2404_v58  ;;  %v2406_v33 = vmul.f32 %v3347_v59, %v3331_v42 }
 0x1a0   : > { %2413 = vst [vmem:[%s3707_s6 + $0x10] sm:$0xff] %v2405_v29  ;;  %v2407_v57 = vmul.f32 %v3349_v55, %v3341_v49  ;;  %v3351_v60 = vpop.eup %3350 }
 0x1a1   : > { %2414 = vst [vmem:[%s3707_s6 + $0x18] sm:$0xff] %v2406_v33  ;;  %v3353_v61 = vpop.eup %3352  ;;  %v2445_v11 = vld [vmem:[%s3707_s6] sm:$0xff] (%p3456_p5) }
 0x1a2   : > { %2415 = vst [vmem:[%s3707_s6 + $0x20] sm:$0xff] %v2407_v57  ;;  %v3355_v62 = vpop.eup %3354  ;;  %2446 = vst [vmem:[%s2432_s10] sm:$0xff] (%p3456_p5), %v2445_v11 }
 0x1a4   : > { %2429 = sbr.rel (!%p3456_p5) target bundleno = 435 (0x1b3), region = 59 }
 0x1a5   : > { %v3357_v10 = vpop.eup %3356 }
 0x1a6   : > { %v3359_v63 = vpop.eup %3358  ;;  %v2408_v0 = vmul.f32 %v3357_v10, %v3351_v60  ;;  %v2447_v5 = vld [vmem:[%s3707_s6 + $0x8] sm:$0xff] (%p3456_p5) }
 0x1a7   : > { %v3361_v2 = vpop.eup %3360  ;;  %v2409_v3 = vmul.f32 %v3359_v63, %v3353_v61  ;;  %v2449_v6 = vld [vmem:[%s3707_s6 + $0x10] sm:$0xff] (%p3456_p5)  ;;  %2448 = vst [vmem:[%s2432_s10 + $0x8] sm:$0xff] (%p3456_p5), %v2447_v5 }
 0x1a8   : > { %2416 = vst [vmem:[%s3707_s6 + $0x28] sm:$0xff] %v2408_v0  ;;  %v2410_v4 = vmul.f32 %v3361_v2, %v3355_v62  ;;  %v2451_v7 = vld [vmem:[%s3707_s6 + $0x18] sm:$0xff] (%p3456_p5)  ;;  %2450 = vst [vmem:[%s2432_s10 + $0x20] sm:$0xff] (%p3456_p5), %v2449_v6 }
 0x1a9   : > { %2417 = vst [vmem:[%s3707_s6 + $0x30] sm:$0xff] %v2409_v3  ;;  %v2453_v9 = vld [vmem:[%s3707_s6 + $0x20] sm:$0xff] (%p3456_p5)  ;;  %2452 = vst [vmem:[%s2432_s10 + $0x28] sm:$0xff] (%p3456_p5), %v2451_v7 }
 0x1aa   : > { %2418 = vst [vmem:[%s3707_s6 + $0x38] sm:$0xff] %v2410_v4  ;;  %2454 = vst [vmem:[%s2432_s10 + $0x40] sm:$0xff] (%p3456_p5), %v2453_v9 }
 0x1af   : > { %v2455_v12 = vld [vmem:[%s3707_s6 + $0x28] sm:$0xff] }
 0x1b0   : > { %2456 = vst [vmem:[%s2432_s10 + $0x48] sm:$0xff] %v2455_v12  ;;  %v2457_v14 = vld [vmem:[%s3707_s6 + $0x30] sm:$0xff] }
 0x1b1   : > { %v2459_v15 = vld [vmem:[%s3707_s6 + $0x38] sm:$0xff]  ;;  %2458 = vst [vmem:[%s2432_s10 + $0x60] sm:$0xff] %v2457_v14 }
 0x1b2   : > { %2460 = vst [vmem:[%s2432_s10 + $0x68] sm:$0xff] %v2459_v15 }
 0x1b3 PF: > { %2466 = sbr.rel (!%p3456_p5) target bundleno = 442 (0x1ba), region = 82  ;;  %s2797_s11 = sshll.u32 (%p3456_p5), %s3441_s3, 4  ;;  %v2482_v17 = vld [vmem:[%s3687_s30] sm:$0xff] (%p3456_p5)  ;;  %v2484_v18 = vld [vmem:[%s3687_s30 + $0x8] sm:$0xff] (%p3456_p5)  ;;  %v2486_v20 = vld [vmem:[%s3687_s30 + $0x10] sm:$0xff] (%p3456_p5) }
 0x1b4   : > { %s2469_s14 = scalar_lea.vmem (%p3456_p5), %s3760_s5, %s2797_s11  ;;  %v2488_v21 = vld [vmem:[%s3687_s30 + $0x18] sm:$0xff] (%p3456_p5)  ;;  %v2490_v13 = vld [vmem:[%s3687_s30 + $0x20] sm:$0xff] (%p3456_p5)  ;;  %v2492_v23 = vld [vmem:[%s3687_s30 + $0x28] sm:$0xff] (%p3456_p5) }
 0x1b5   : > { %2483 = vst [vmem:[%s2469_s14] sm:$0xff] (%p3456_p5), %v2482_v17  ;;  %2485 = vst [vmem:[%s2469_s14 + $0x8] sm:$0xff] (%p3456_p5), %v2484_v18  ;;  %v2494_v24 = vld [vmem:[%s3687_s30 + $0x30] sm:$0xff] (%p3456_p5)  ;;  %v2496_v52 = vld [vmem:[%s3687_s30 + $0x38] sm:$0xff] (%p3456_p5) }
 0x1b6   : > { %2487 = vst [vmem:[%s2469_s14 + $0x20] sm:$0xff] (%p3456_p5), %v2486_v20  ;;  %2489 = vst [vmem:[%s2469_s14 + $0x28] sm:$0xff] (%p3456_p5), %v2488_v21 }
 0x1b7   : > { %2491 = vst [vmem:[%s2469_s14 + $0x40] sm:$0xff] (%p3456_p5), %v2490_v13  ;;  %2493 = vst [vmem:[%s2469_s14 + $0x48] sm:$0xff] (%p3456_p5), %v2492_v23 }
 0x1b8   : > { %2495 = vst [vmem:[%s2469_s14 + $0x60] sm:$0xff] (%p3456_p5), %v2494_v24  ;;  %2497 = vst [vmem:[%s2469_s14 + $0x68] sm:$0xff] (%p3456_p5), %v2496_v52 }
 0x1ba PF: > { %p18_p11 = scmp.ge.s32.totalorder %s3444_s23, 4   ;;  %s3762_s20 = smov %s3382_s21 }
 0x1bb   : > { %s3763_s21 = smov %s3454_s26  ;;  %s3764_s22 = smov %s3444_s23 }
 0x1bc   :  { %20 = sbr.rel (!%p18_p11) target bundleno = 5 (0x5), region = 327 }

</bundles_post_ra>
